<compile_context>
chip_gen: v7x
topology: tpu7x:2x2x1
jax: 0.10.0
libtpu: 0.0.40
codegen_flags: <defaults>
</compile_context>

<pallas_src>
import functools

import jax
import jax.numpy as jnp
import numpy as np
from jax import lax
from jax.experimental import pallas as pl
from jax.experimental.pallas import tpu as pltpu

_LANE = 128
_TILE_BYTES_TARGET = 4 * 1024 * 1024   # per-input, per-buffer VMEM tile budget
_VMEM_LIMIT_BYTES = 48 * 1024 * 1024   # scoped VMEM limit (< v7x 64 MiB physical)


def _round_up(x, m):
    return (x + m - 1) // m * m


def _cdiv(a, b):
    return (a + b - 1) // b


@functools.lru_cache(maxsize=1)
def _detected_num_slices():
    """Best-effort TensorCore count (v7x/megacore -> 2); defaults to 1."""
    try:
        info = pltpu.get_tpu_info()
    except Exception:
        return 1
    for attr in ("num_tensorcores", "tensorcores_per_chip", "num_cores_per_chip",
                 "num_cores", "core_count"):
        v = getattr(info, attr, None)
        if isinstance(v, (int, np.integer)) and 1 <= int(v) <= 8:
            return int(v)
    return 1


# ----------------------------- in-kernel helpers -----------------------------

def _masked(x, mask):
    return x if mask is None else jnp.where(mask, x, 0.0)


def _softmax_rows(x, *, approx):
    m = jnp.max(x, axis=1, keepdims=True)
    e = jnp.exp(x - m)
    s = jnp.sum(e, axis=1, keepdims=True)
    if approx:
        return e * pl.reciprocal(s, approx=True)
    return e / s


def _softmax_and_log(x):
    # (p, log p) with one exp per element and one log / reciprocal per row.
    m = jnp.max(x, axis=1, keepdims=True)
    z = x - m
    e = jnp.exp(z)
    s = jnp.sum(e, axis=1, keepdims=True)
    return e * pl.reciprocal(s, approx=True), z - jnp.log(s)


def _grid_reduce(out_ref, acc_ref, compute_fn, *, tile, n_rows, inv_denom, any_ragged):
    """Shared init / accumulate / finalize driver for all loss kernels.

    Grid is (slices, steps): axis 0 is "parallel" (TensorCore split), axis 1 is the
    "arbitrary" reduction axis.  compute_fn(row_mask_or_None) returns a 2-D loss tile
    for the current block.  acc_ref is a (1, loss_cols) VMEM scratch holding this
    slice's running partial; out_ref is this slice's (1, 1, 1) resident output block.
    """
    c = pl.program_id(0)
    i = pl.program_id(1)
    steps = pl.num_programs(1)
    g = c * steps + i                      # global step index (may exceed coverage)

    @pl.when(i == 0)
    def _():
        acc_ref[...] = jnp.zeros_like(acc_ref)

    def _acc(mask):
        acc_ref[...] += jnp.sum(compute_fn(mask), axis=0, keepdims=True)

    if any_ragged:
        ragged = (g + 1) * tile > n_rows   # only the last / slice-overhang blocks

        @pl.when(jnp.logical_not(ragged))
        def _():
            _acc(None)

        @pl.when(ragged)
        def _():
            row = g * tile + lax.broadcasted_iota(jnp.int32, (tile, 1), 0)
            _acc(row < n_rows)
    else:
        _acc(None)

    @pl.when(i == steps - 1)
    def _():
        total = jnp.sum(acc_ref[...], axis=1, keepdims=True) * jnp.float32(inv_denom)
        out_ref[...] = total.reshape(1, 1, 1)


# --------------------------------- kernels -----------------------------------

def _ce_kernel(x_ref, t_ref, out_ref, acc_ref, *, n_rows, inv_denom, any_ragged):
    # nn.CrossEntropyLoss(reduction='mean') with integer class targets.
    def compute(mask):
        x = _masked(x_ref[...].astype(jnp.float32), mask)           # (TM, C)
        t = t_ref[...]                                               # (TM, 1) int32
        m = jnp.max(x, axis=1, keepdims=True)
        lse = jnp.log(jnp.sum(jnp.exp(x - m), axis=1, keepdims=True)) + m
        col = lax.broadcasted_iota(jnp.int32, x.shape, 1)
        picked = jnp.sum(jnp.where(col == t, x, 0.0), axis=1, keepdims=True)
        return _masked(lse - picked, mask)                           # (TM, 1)

    _grid_reduce(out_ref, acc_ref, compute, tile=x_ref.shape[0], n_rows=n_rows,
                 inv_denom=inv_denom, any_ragged=any_ragged)


def _mse_kernel(a_ref, b_ref, out_ref, acc_ref, *, n_rows, inv_denom, any_ragged):
    # MSELoss(softmax(outputs), softmax(targets)), mean over all elements.
    def compute(mask):
        p = _softmax_rows(_masked(a_ref[...].astype(jnp.float32), mask), approx=False)
        q = _softmax_rows(_masked(b_ref[...].astype(jnp.float32), mask), approx=False)
        d = p - q
        return _masked(d * d, mask)

    _grid_reduce(out_ref, acc_ref, compute, tile=a_ref.shape[0], n_rows=n_rows,
                 inv_denom=inv_denom, any_ragged=any_ragged)


def _kl_kernel(a_ref, b_ref, out_ref, acc_ref, *, n_rows, inv_denom, any_ragged):
    # Faithful to the module: softmax *probabilities* are fed as KLDivLoss "input".
    #   loss1+loss2 = sum( q*log q + p*log p - 2*p*q ) / N   (batchmean)
    # log-softmax form: log p = z - log(sum(exp z)) -> 2 exp/elem, per-row log only.
    def compute(mask):
        p, logp = _softmax_and_log(_masked(a_ref[...].astype(jnp.float32), mask))
        q, logq = _softmax_and_log(_masked(b_ref[...].astype(jnp.float32), mask))
        return _masked(p * logp + q * logq - 2.0 * p * q, mask)

    _grid_reduce(out_ref, acc_ref, compute, tile=a_ref.shape[0], n_rows=n_rows,
                 inv_denom=inv_denom, any_ragged=any_ragged)


def _kl_new_kernel(a_ref, b_ref, out_ref, acc_ref, *, n_rows, inv_denom, any_ragged):
    # sigmoid both, KLDivLoss on log(sigmoid(.)) in both directions:
    #   loss1+loss2 = sum((sig(xt) - sig(xo)) * (log_sig(xt) - log_sig(xo))) / N
    # sigmoid / log_sigmoid share one exp(-|x|) per input (stable for large |x|).
    def compute(mask):
        xo = _masked(a_ref[...].astype(jnp.float32), mask)
        xt = _masked(b_ref[...].astype(jnp.float32), mask)
        eo = jnp.exp(-jnp.abs(xo))
        et = jnp.exp(-jnp.abs(xt))
        so = jnp.where(xo >= 0.0, 1.0, eo) * pl.reciprocal(1.0 + eo, approx=True)
        st = jnp.where(xt >= 0.0, 1.0, et) * pl.reciprocal(1.0 + et, approx=True)
        lso = jnp.minimum(xo, 0.0) - jnp.log1p(eo)
        lst = jnp.minimum(xt, 0.0) - jnp.log1p(et)
        return _masked((st - so) * (lst - lso), mask)

    _grid_reduce(out_ref, acc_ref, compute, tile=a_ref.shape[0], n_rows=n_rows,
                 inv_denom=inv_denom, any_ragged=any_ragged)


def _ml_kernel(a_ref, b_ref, out_ref, acc_ref, *, n_rows, inv_denom, any_ragged):
    # nn.BCEWithLogitsLoss(pos_weight=None), mean over all elements:
    #   max(x,0) - x*y + log1p(exp(-|x|))
    def compute(mask):
        x = _masked(a_ref[...].astype(jnp.float32), mask)
        y = _masked(b_ref[...].astype(jnp.float32), mask)
        loss = jnp.maximum(x, 0.0) - x * y + jnp.log1p(jnp.exp(-jnp.abs(x)))
        return _masked(loss, mask)

    _grid_reduce(out_ref, acc_ref, compute, tile=a_ref.shape[0], n_rows=n_rows,
                 inv_denom=inv_denom, any_ragged=any_ragged)


# --------------------------------- wrappers ------------------------------------

def _tiled_reduce(kernel, arrays, n_rows, acc_cols, denom, num_slices):
    """Row-tiled full reduction over (n_rows, Ci) arrays sharing the leading dim."""
    if num_slices is None:
        num_slices = _detected_num_slices()

    # Tile rows from the per-input VMEM byte budget (lane-padded footprint); no cap
    # other than the array itself.  Inputs are never padded/copied in HBM.
    bytes_per_row = max(_round_up(a.shape[1], _LANE) * a.dtype.itemsize for a in arrays)
    tile = max(8, (_TILE_BYTES_TARGET // bytes_per_row) // 8 * 8)
    tile = min(tile, _round_up(n_rows, 8))

    total_steps = _cdiv(n_rows, tile)
    num_slices = max(1, min(int(num_slices), 8, total_steps))
    steps_per_slice = _cdiv(total_steps, num_slices)
    any_ragged = num_slices * steps_per_slice * tile > n_rows

    def row_map(c, i):
        g = c * steps_per_slice + i
        return (jnp.minimum(g, total_steps - 1), 0)   # never issue a fully-OOB DMA

    out = pl.pallas_call(
        functools.partial(kernel, n_rows=n_rows, inv_denom=1.0 / float(denom),
                          any_ragged=any_ragged),
        out_shape=jax.ShapeDtypeStruct((num_slices, 1, 1), jnp.float32),
        grid=(num_slices, steps_per_slice),
        in_specs=[pl.BlockSpec((tile, a.shape[1]), row_map) for a in arrays],
        out_specs=pl.BlockSpec((1, 1, 1), lambda c, i: (c, 0, 0)),
        scratch_shapes=[pltpu.VMEM((1, acc_cols), jnp.float32)],
        compiler_params=pltpu.CompilerParams(
            dimension_semantics=("parallel", "arbitrary"),
            vmem_limit_bytes=_VMEM_LIMIT_BYTES),
    )(*arrays)
    return jnp.sum(out)


def _lane_dense(arrays):
    """Lane-dense (rows, 128) view for purely-elementwise losses when the element
    count allows it (a free reshape: no padding, no extra HBM traffic)."""
    n, c = arrays[0].shape
    total = n * c
    rows = total // _LANE
    if total % _LANE == 0 and rows >= 8:
        return [a.reshape(rows, _LANE) for a in arrays], rows, _LANE
    return list(arrays), n, c


def set_criterion(outputs, targets, type, *, num_slices=None):  # noqa: A002
    """JAX/Pallas equivalent of SetCriterion.forward (weights=None, reduction='mean')."""
    n, c = outputs.shape
    if type == 'CE':
        tgt = targets.astype(jnp.int32).reshape(n, 1)
        return _tiled_reduce(_ce_kernel, [outputs, tgt], n, 1, n, num_slices)
    if type == 'MSE':
        return _tiled_reduce(_mse_kernel, [outputs, targets], n, c, n * c, num_slices)
    if type == 'KL':
        return _tiled_reduce(_kl_kernel, [outputs, targets], n, c, n, num_slices)
    if type == 'KL_new':
        arrs, rows, cols = _lane_dense([outputs, targets])
        return _tiled_reduce(_kl_new_kernel, arrs, rows, cols, n, num_slices)
    if type == 'ML':
        arrs, rows, cols = _lane_dense([outputs, targets])
        return _tiled_reduce(_ml_kernel, arrs, rows, cols, n * c, num_slices)
    raise ValueError(f"unknown loss type: {type}")


# ------------------------------ pure-JAX reference ------------------------------

def _ref_set_criterion(outputs, targets, type):  # noqa: A002
    xlogy = jax.scipy.special.xlogy
    outputs = outputs.astype(jnp.float32)
    n = outputs.shape[0]
    if type == 'CE':
        logp = jax.nn.log_softmax(outputs, axis=1)
        picked = jnp.take_along_axis(logp, targets.astype(jnp.int32)[:, None], axis=1)
        return -jnp.mean(picked)
    if type == 'MSE':
        p = jax.nn.softmax(outputs, axis=1)
        q = jax.nn.softmax(targets.astype(jnp.float32), axis=1)
        return jnp.mean((p - q) ** 2)
    if type == 'KL':
        p = jax.nn.softmax(outputs, axis=1)
        q = jax.nn.softmax(targets.astype(jnp.float32), axis=1)
        kl1 = jnp.sum(xlogy(q, q) - q * p) / n
        kl2 = jnp.sum(xlogy(p, p) - p * q) / n
        return kl1 + kl2
    if type == 'KL_new':
        t = targets.astype(jnp.float32)
        so, st = jax.nn.sigmoid(outputs), jax.nn.sigmoid(t)
        lso, lst = jax.nn.log_sigmoid(outputs), jax.nn.log_sigmoid(t)
        kl1 = jnp.sum(xlogy(st, st) - st * lso) / n
        kl2 = jnp.sum(xlogy(so, so) - so * lst) / n
        return kl1 + kl2
    if type == 'ML':
        x, y = outputs, targets.astype(jnp.float32)
        return jnp.mean(jnp.maximum(x, 0.0) - x * y + jnp.log1p(jnp.exp(-jnp.abs(x))))
    raise ValueError(type)


# ----------------------------------- main --------------------------------------

if __name__ == "__main__":
    def run_case(key, n, c, num_slices=None, types=None):
        k1, k2, k3, k4 = jax.random.split(key, 4)
        outputs = jax.random.normal(k1, (n, c), dtype=jnp.float32)
        tgt_logits = jax.random.normal(k2, (n, c), dtype=jnp.float32)
        tgt_idx = jax.random.randint(k3, (n,), 0, c, dtype=jnp.int32)
        tgt_multi = (jax.random.uniform(k4, (n, c)) > 0.5).astype(jnp.float32)
        cases = {
            'CE': (outputs, tgt_idx),
            'MSE': (outputs, tgt_logits),
            'KL': (outputs, tgt_logits),
            'KL_new': (outputs, tgt_logits),
            'ML': (outputs, tgt_multi),
        }
        for name in (types or list(cases.keys())):
            o, t = cases[name]
            got = jax.block_until_ready(set_criterion(o, t, name, num_slices=num_slices))
            want = jax.block_until_ready(_ref_set_criterion(o, t, name))
            np.testing.assert_allclose(
                np.asarray(got), np.asarray(want), rtol=5e-3, atol=1e-6,
                err_msg=f"{name} n={n} c={c} slices={num_slices}")

    # Small shapes consistent with the module (batch=8, classes=32): single-tile path.
    run_case(jax.random.PRNGKey(0), 8, 32)
    # Multi-tile grid with a ragged (masked) last block on both the row-softmax and
    # the lane-dense elementwise paths (no input padding anywhere).
    run_case(jax.random.PRNGKey(1), 5000, 256)
    # Explicit 2-slice ("parallel" TensorCore axis) path, incl. the slice-overhang mask.
    run_case(jax.random.PRNGKey(2), 5000, 256, num_slices=2, types=('KL', 'ML'))

    print("KERNEL_OK")
</pallas_src>

<mosaic_0001>
module attributes {stable_mosaic.version = 11 : i64} {
  func.func @_ce_kernel(%arg0: i32, %arg1: i32, %arg2: memref<8x32xf32, #tpu.memory_space<vmem>>, %arg3: memref<8x1xi32, #tpu.memory_space<vmem>>, %arg4: memref<1x1x1xf32, #tpu.memory_space<vmem>>, %arg5: memref<1x1xf32, #tpu.memory_space<vmem>>) attributes {dimension_semantics = [#tpu.dimension_semantics<parallel>, #tpu.dimension_semantics<arbitrary>], iteration_bounds = array<i64: 1, 1>, scalar_prefetch = 0 : i64, scratch_operands = 1 : i64, tpu.core_type = #tpu.core_type<tc>, window_params = [{transform_indices = @transform_0, window_bounds = array<i64: 8, 32>}, {transform_indices = @transform_1, window_bounds = array<i64: 8, 1>}, {transform_indices = @transform_2, window_bounds = array<i64: 1, 1, 1>}]} {
    %c0_i32 = arith.constant 0 : i32
    %0 = arith.cmpi eq, %arg1, %c0_i32 : i32
    %1 = arith.extui %0 : i1 to i32
    %c0_i32_0 = arith.constant 0 : i32
    %2 = arith.cmpi ne, %1, %c0_i32_0 : i32
    scf.if %2 {
      %cst_14 = arith.constant 0.000000e+00 : f32
      %30 = vector.broadcast %cst_14 : f32 to vector<1x1xf32>
      %c0_15 = arith.constant 0 : index
      %c0_16 = arith.constant 0 : index
      %31 = vector.load %arg5[%c0_15, %c0_16] : memref<1x1xf32, #tpu.memory_space<vmem>>, vector<1x1xf32>
      tpu.vector_store %arg5[%c0_15, %c0_16], %30 {strides = array<i32>} : memref<1x1xf32, #tpu.memory_space<vmem>>, vector<1x1xf32>,
    } else {
    }
    %c0 = arith.constant 0 : index
    %c0_1 = arith.constant 0 : index
    %3 = vector.load %arg5[%c0, %c0_1] : memref<1x1xf32, #tpu.memory_space<vmem>>, vector<1x1xf32>
    %c0_2 = arith.constant 0 : index
    %c0_3 = arith.constant 0 : index
    %4 = vector.load %arg2[%c0_2, %c0_3] : memref<8x32xf32, #tpu.memory_space<vmem>>, vector<8x32xf32>
    %c0_4 = arith.constant 0 : index
    %c0_5 = arith.constant 0 : index
    %5 = vector.load %arg3[%c0_4, %c0_5] : memref<8x1xi32, #tpu.memory_space<vmem>>, vector<8x1xi32>
    %cst = arith.constant dense<0xFF800000> : vector<8xf32>
    %6 = vector.multi_reduction <maximumf>, %4, %cst [1] : vector<8x32xf32> to vector<8xf32>
    %7 = vector.shape_cast %6 : vector<8xf32> to vector<8x1xf32>
    %8 = vector.broadcast %7 : vector<8x1xf32> to vector<8x32xf32>
    %9 = arith.subf %4, %8 : vector<8x32xf32>
    %10 = math.exp %9 : vector<8x32xf32>
    %cst_6 = arith.constant dense<0.000000e+00> : vector<8xf32>
    %11 = vector.multi_reduction <add>, %10, %cst_6 [1] : vector<8x32xf32> to vector<8xf32>
    %12 = vector.shape_cast %11 : vector<8xf32> to vector<8x1xf32>
    %13 = math.log %12 : vector<8x1xf32>
    %14 = arith.addf %13, %7 : vector<8x1xf32>
    %15 = tpu.iota {dimensions = array<i32: 1>} : vector<8x32xi32>
    %16 = vector.broadcast %5 : vector<8x1xi32> to vector<8x32xi32>
    %17 = arith.cmpi eq, %15, %16 : vector<8x32xi32>
    %cst_7 = arith.constant 0.000000e+00 : f32
    %18 = vector.broadcast %cst_7 : f32 to vector<8x32xf32>
    %19 = arith.select %17, %4, %18 : vector<8x32xi1>, vector<8x32xf32>
    %cst_8 = arith.constant dense<0.000000e+00> : vector<8xf32>
    %20 = vector.multi_reduction <add>, %19, %cst_8 [1] : vector<8x32xf32> to vector<8xf32>
    %21 = vector.shape_cast %20 : vector<8xf32> to vector<8x1xf32>
    %22 = arith.subf %14, %21 : vector<8x1xf32>
    %cst_9 = arith.constant dense<0.000000e+00> : vector<1xf32>
    %23 = vector.multi_reduction <add>, %22, %cst_9 [0] : vector<8x1xf32> to vector<1xf32>
    %24 = vector.shape_cast %23 : vector<1xf32> to vector<1x1xf32>
    %25 = arith.addf %3, %24 : vector<1x1xf32>
    %c0_10 = arith.constant 0 : index
    %c0_11 = arith.constant 0 : index
    %26 = vector.load %arg5[%c0_10, %c0_11] : memref<1x1xf32, #tpu.memory_space<vmem>>, vector<1x1xf32>
    tpu.vector_store %arg5[%c0_10, %c0_11], %25 {strides = array<i32>} : memref<1x1xf32, #tpu.memory_space<vmem>>, vector<1x1xf32>,
    %c0_i32_12 = arith.constant 0 : i32
    %27 = arith.cmpi eq, %arg1, %c0_i32_12 : i32
    %28 = arith.extui %27 : i1 to i32
    %c0_i32_13 = arith.constant 0 : i32
    %29 = arith.cmpi ne, %28, %c0_i32_13 : i32
    scf.if %29 {
      %c0_14 = arith.constant 0 : index
      %c0_15 = arith.constant 0 : index
      %30 = vector.load %arg5[%c0_14, %c0_15] : memref<1x1xf32, #tpu.memory_space<vmem>>, vector<1x1xf32>
      %cst_16 = arith.constant dense<0.000000e+00> : vector<1xf32>
      %31 = vector.multi_reduction <add>, %30, %cst_16 [1] : vector<1x1xf32> to vector<1xf32>
      %32 = vector.shape_cast %31 : vector<1xf32> to vector<1x1xf32>
      %cst_17 = arith.constant 1.250000e-01 : f32
      %33 = vector.broadcast %cst_17 : f32 to vector<1x1xf32>
      %34 = arith.mulf %32, %33 : vector<1x1xf32>
      %35 = vector.shape_cast %34 : vector<1x1xf32> to vector<1x1x1xf32>
      %c0_18 = arith.constant 0 : index
      %c0_19 = arith.constant 0 : index
      %c0_20 = arith.constant 0 : index
      %36 = vector.load %arg4[%c0_18, %c0_19, %c0_20] : memref<1x1x1xf32, #tpu.memory_space<vmem>>, vector<1x1x1xf32>
      tpu.vector_store %arg4[%c0_18, %c0_19, %c0_20], %35 {strides = array<i32>} : memref<1x1x1xf32, #tpu.memory_space<vmem>>, vector<1x1x1xf32>,
    } else {
    }
    return
  }
  func.func @transform_0(%arg0: i32, %arg1: i32) -> (i32, i32) {
    %c1_i32 = arith.constant 1 : i32
    %0 = arith.muli %arg0, %c1_i32 : i32
    %1 = arith.addi %0, %arg1 : i32
    %c0_i32 = arith.constant 0 : i32
    %2 = arith.minsi %1, %c0_i32 : i32
    %c0_i32_0 = arith.constant 0 : i32
    %c0_i32_1 = arith.constant 0 : i32
    return %2, %c0_i32_0 : i32, i32
  }
  func.func @transform_1(%arg0: i32, %arg1: i32) -> (i32, i32) {
    %c1_i32 = arith.constant 1 : i32
    %0 = arith.muli %arg0, %c1_i32 : i32
    %1 = arith.addi %0, %arg1 : i32
    %c0_i32 = arith.constant 0 : i32
    %2 = arith.minsi %1, %c0_i32 : i32
    %c0_i32_0 = arith.constant 0 : i32
    %c0_i32_1 = arith.constant 0 : i32
    return %2, %c0_i32_0 : i32, i32
  }
  func.func @transform_2(%arg0: i32, %arg1: i32) -> (i32, i32, i32) {
    %c0_i32 = arith.constant 0 : i32
    %c0_i32_0 = arith.constant 0 : i32
    %c0_i32_1 = arith.constant 0 : i32
    return %arg0, %c0_i32, %c0_i32_0 : i32, i32, i32
  }
}

</mosaic_0001>

<bundles_post_ra>
// kernel: tpu_custom_call.1
= control target key start
LH: loop header
LB: loop body
LE: loop exit
PB: predicated region body
PF: predicated region fallthrough
CT: control target
= control target key end

     0   :  { %vm75_vm0 = vcmask 261120   ;;  %s215_s0 = inlined_call_operand.vmem [shape: f32[8,32], index: 0, kind: input, shape index: {}]   ;;  %s216_s1 = inlined_call_operand.vmem [shape: s32[8,1], index: 1, kind: input, shape index: {}]   ;;  %s217_s2 = inlined_call_operand.hbm [shape: f32[1,1,1], index: 2, kind: output, shape index: {}]  }
   0x1   :  { %v73_v0 = vld [vmem:[%s215_s0] sm:$0xff] }
   0x2   :  { %7 = vsyncpa [#allocation4], 0  ;;  %v76_v1 = vsel %vm75_vm0, %v73_v0, -inf  ;;  %v173_v2 = vmov 0   ;;  %v74_v3 = vld [vmem:[%s216_s1] sm:$0xff]  ;;  %v88_v7 = vlaneseq  ;;  %vm70_vm2 = vcmask 0  }
   0x3   :  { %144 = vset.pattern.permute.xlu0 %v173_v2  ;;  %v174_v14 = vmov 0.0   ;;  %s175_s0 = smov [#allocation3]  }
   0x4   :  { %77 = vmax.xlane.f32.xlu0 %v76_v1  ;;  %v89_v8 = vand.u32 127, %v88_v7  ;;  %71 = vst.msk [vmem:[#allocation2] sm:$0x1] %vm70_vm2, %v174_v14  ;;  %s121_s1 = sshll.u32 %s175_s0, 4  ;;  %s122_s1 = int_to_ptr.vmem [resolvable:$true] %s121_s1 }
   0x5   :  { %s149_s13 = scalar_lea.vmem %s122_s1, 16  ;;  %s153_s14 = scalar_lea.vmem %s122_s1, 32 }
   0x6   :  { %p150_p0 = scmp.ne.s32.totalorder %s122_s1, %s149_s13  ;;  %p154_p1 = scmp.lt.s32.totalorder %s122_s1, %s122_s1 }
   0x7   :  { %p155_p2 = scmp.lt.s32.totalorder %s153_s14, %s149_s13 }
   0x9   :  { %p156_p3 = por %p155_p2, %p154_p1 }
   0xb   :  { %v72_v26 = vld [vmem:[#allocation2] sm:$0x1]  ;;  %p157_p4 = pnand %p156_p3, %p150_p0 }
  0x1a   :  { %91 = vperm.xlu0 %144, %v74_v3  }
  0x91   :  { %v78_v4 = vpop.xlane.xlu0 %77 }
  0x92   :  { %v79_v5 = vsub.f32 %v73_v0, %v78_v4 }
  0x94   :  { %v80_v6 = vmul.f32 1.442695, %v79_v5 }
  0x96   :  { %145 = vpow2.f32 %v80_v6 }
  0x99   :  { %v92_v9 = vpop.permute.xlu0 %91 }
  0x9a   :  { %vm93_vm1 = vcmp.eq.s32.totalorder %v89_v8, %v92_v9 }
  0x9b   :  { %v94_v11 = vsel %vm93_vm1, %v73_v0, 0.0 }
  0x9c   :  { %v95_v13 = vsel %vm75_vm0, %v94_v11, 0.0 }
  0xa0   :  { %v146_v10 = vpop.eup %145 }
  0xa1   :  { %v82_v12 = vsel %vm75_vm0, %v146_v10, 0.0 }
  0xa2   :  { %83 = vadd.xlane.f32.xlu1 %v82_v12 }
  0xa6   :  { %96 = vadd.xlane.f32.xlu1 %v95_v13 }
 0x12f   :  { %v84_v15 = vpop.xlane.xlu1 %83 }
 0x130   :  { %147 = vlog2.f32 %v84_v15 }
 0x133   :  { %v97_v18 = vpop.xlane.xlu1 %96 }
 0x13a   :  { %v148_v16 = vpop.eup %147 }
 0x13b   :  { %v86_v17 = vmul.f32 0.6931472, %v148_v16 }
 0x13d   :  { %v87_v19 = vadd.f32 %v86_v17, %v78_v4 }
 0x13f   :  { %v98_v20 = vsub.f32 %v87_v19, %v97_v18 }
 0x141   :  { %v99_v21 = vrot.slane %v98_v20, 4 }
 0x143   :  { %v100_v22 = vadd.f32 %v99_v21, %v98_v20 }
 0x145   :  { %v101_v23 = vrot.slane %v100_v22, 2 }
 0x147   :  { %v102_v24 = vadd.f32 %v101_v23, %v100_v22 }
 0x149   :  { %v103_v25 = vrot.slane %v102_v24, 1 }
 0x14b   :  { %v104_v27 = vadd.f32 %v103_v25, %v102_v24 }
 0x14d   :  { %v105_v28 = vadd.f32 %v104_v27, %v72_v26 }
 0x14f   :  { %107 = vst.msk [vmem:[#allocation2] sm:$0x1] %vm70_vm2, %v105_v28 }
 0x156   :  { %v111_v29 = vld [vmem:[#allocation2] sm:$0x1] }
 0x157   :  { %v113_v30 = vmul.f32 0.125, %v111_v29 }
 0x159   :  { %114 = vst.msk [vmem:[#allocation3] sm:$0x1] %vm70_vm2, %v113_v30 }
 0x15a   :  { %160 = shalt.err (!%p157_p4)
}
 0x15b   :  { %s161_s17 = scalar_lea.hbm %s217_s2, 16 }
 0x15c   :  { %p162_p5 = scmp.ne.s32.totalorder %s217_s2, %s161_s17  ;;  %p165_p6 = scmp.lt.u32.totalorder %s161_s17, %s217_s2 }
 0x15e   :  { %p167_p7 = pnand %p165_p6, %p162_p5 }
 0x160   :  { %170 = shalt.err (!%p167_p7)
}
 0x161   :  { %124 = dma.vmem_to_hbm [thread:$0]  %s122_s1, 16, %s217_s2, [#allocation4]  }
 0x162   :  { %171 = dma.done.wait [#allocation4], 16  }
 0x163   :  { %172 = vsyncadd [#allocation4], 4294967280 }
 0x164   :  { %128 = vsyncpa [#allocation4], 1 }

</bundles_post_ra>
